<compile_context>
chip_gen: v7x
topology: tpu7x:2x2x1
jax: 0.10.0
libtpu: 0.0.40
codegen_flags: <defaults>
</compile_context>

<pallas_src>
import math

import jax
import jax.numpy as jnp
from jax.experimental import pallas as pl
from jax.experimental.pallas import tpu as pltpu

_SQRT_2_OVER_PI = math.sqrt(2.0 / math.pi)
_LANE_CANDIDATES = (4096, 2048, 1024, 512, 256, 128)


def _gelu_math_f32(x_f32):
    inner = _SQRT_2_OVER_PI * (x_f32 + 0.044715 * x_f32 * x_f32 * x_f32)
    return 0.5 * x_f32 * (1.0 + jnp.tanh(inner))


def _gelu_kernel(x_ref, o_ref):
    # Compute in f32 regardless of storage dtype (free: VPU/EUP slack on a
    # DMA-bound kernel; v5e has no bf16 vector path anyway).
    x = x_ref[...].astype(jnp.float32)
    o_ref[...] = _gelu_math_f32(x).astype(o_ref.dtype)


def _gelu_jnp(x):
    # Plain-XLA path for the tiny (<128 element) ragged tail.
    return _gelu_math_f32(x.astype(jnp.float32)).astype(x.dtype)


def _sublane_multiple(dtype) -> int:
    return {4: 8, 2: 16, 1: 32}.get(jnp.dtype(dtype).itemsize, 8)


def _pick_lane(n: int):
    # Widest lane dim (multiple of 128, capped at 4096) that divides n exactly
    # so the reshape to a lane-dense 2D slab is copy-free.
    for c in _LANE_CANDIDATES:
        if n % c == 0:
            return c
    return None


def _gelu_2d(x2d, *, target_block_bytes: int):
    rows, lane = x2d.shape
    dtype = x2d.dtype
    itemsize = jnp.dtype(dtype).itemsize
    sub = _sublane_multiple(dtype)

    # ~target_block_bytes per block, rounded to the dtype's sublane multiple.
    rows_per_block = max(1, target_block_bytes // (lane * itemsize))
    if rows <= sub:
        tile_rows = rows  # full-dim block (allowed even if < 8)
    else:
        tile_rows = min(rows_per_block, rows)
        tile_rows = max(sub, (tile_rows // sub) * sub)
        # v7x has 2 TensorCores sharding the 'parallel' axis; guarantee >= 2
        # grid steps when the row dim allows it (halving a DMA-bound block is
        # near-free, leaving a core idle is up to ~2x).
        while pl.cdiv(rows, tile_rows) < 2 and tile_rows > sub:
            tile_rows = max(sub, ((tile_rows // 2) // sub) * sub)

    grid = (pl.cdiv(rows, tile_rows),)

    n_elems = rows * lane
    cost = pl.CostEstimate(
        flops=8 * n_elems,
        transcendentals=n_elems,
        bytes_accessed=2 * n_elems * itemsize,
    )

    return pl.pallas_call(
        _gelu_kernel,
        out_shape=jax.ShapeDtypeStruct((rows, lane), dtype),
        grid_spec=pltpu.PrefetchScalarGridSpec(
            num_scalar_prefetch=0,
            grid=grid,
            in_specs=[pl.BlockSpec((tile_rows, lane), lambda i: (i, 0))],
            out_specs=pl.BlockSpec((tile_rows, lane), lambda i: (i, 0)),
        ),
        compiler_params=pltpu.CompilerParams(
            dimension_semantics=("parallel",),
            # 2 x 4 MiB in + 2 x 4 MiB out double-buffered blocks + headroom;
            # within scoped/physical VMEM on v5e/v6e (128 MiB) and v7x (64 MiB).
            vmem_limit_bytes=32 * 1024 * 1024,
            # Let XLA fuse an upstream elementwise producer into the input DMA.
            allow_input_fusion=[True],
        ),
        cost_estimate=cost,
    )(x2d)


def gelu_pallas(x, *, target_block_bytes: int = 4 * 1024 * 1024):
    orig_shape = x.shape
    n = x.size
    if n == 0:
        return x

    x_flat = x.reshape(-1)

    lane = _pick_lane(n)
    if lane is not None:
        # Common case: copy-free reshape to a lane-dense slab.
        out2d = _gelu_2d(x_flat.reshape(n // lane, lane),
                         target_block_bytes=target_block_bytes)
        return out2d.reshape(orig_shape)

    # Ragged fallback (n not a multiple of 128): run the divisible bulk
    # through the kernel and the <128-element tail through plain XLA. Avoids
    # the old whole-array jnp.pad + output-slice round trip.
    n_bulk = (n // 128) * 128
    tail_out = _gelu_jnp(x_flat[n_bulk:])
    if n_bulk == 0:
        out_flat = tail_out
    else:
        lane_b = _pick_lane(n_bulk)
        bulk_out = _gelu_2d(x_flat[:n_bulk].reshape(n_bulk // lane_b, lane_b),
                            target_block_bytes=target_block_bytes)
        out_flat = jnp.concatenate([bulk_out.reshape(-1), tail_out])
    return out_flat.reshape(orig_shape)


def gelu_ref(x):
    c = math.sqrt(2.0 / math.pi)
    return 0.5 * x * (1.0 + jnp.tanh(c * (x + 0.044715 * jnp.power(x, 3))))


if __name__ == "__main__":
    key = jax.random.PRNGKey(0)

    # Main case: the PyTorch module's expected small 4D input.
    x = jax.random.normal(key, (2, 4, 16, 16), dtype=jnp.float32)
    out = gelu_pallas(x)
    jax.block_until_ready(out)
    assert out.shape == x.shape and out.dtype == x.dtype
    assert jnp.allclose(out, gelu_ref(x), atol=1e-5, rtol=1e-5)

    # Ragged case A: n < 128 (pure XLA tail path).
    x2 = jax.random.normal(jax.random.PRNGKey(0), (3, 5, 7), dtype=jnp.float32)
    out2 = gelu_pallas(x2)
    jax.block_until_ready(out2)
    assert out2.shape == x2.shape and out2.dtype == x2.dtype
    assert jnp.allclose(out2, gelu_ref(x2), atol=1e-5, rtol=1e-5)

    # Ragged case B: kernel bulk + tiny tail (split path).
    x3 = jax.random.normal(jax.random.PRNGKey(0), (5, 7, 11), dtype=jnp.float32)
    out3 = gelu_pallas(x3)
    jax.block_until_ready(out3)
    assert out3.shape == x3.shape and out3.dtype == x3.dtype
    assert jnp.allclose(out3, gelu_ref(x3), atol=1e-5, rtol=1e-5)

    print("KERNEL_OK")
</pallas_src>

<mosaic_0001>
module attributes {stable_mosaic.version = 11 : i64} {
  func.func @_gelu_kernel(%arg0: i32, %arg1: memref<1x2048xf32, #tpu.memory_space<vmem>>, %arg2: memref<1x2048xf32, #tpu.memory_space<vmem>>) attributes {dimension_semantics = [#tpu.dimension_semantics<parallel>], iteration_bounds = array<i64: 1>, scalar_prefetch = 0 : i64, scratch_operands = 0 : i64, tpu.core_type = #tpu.core_type<tc>, window_params = [{transform_indices = @transform_0, window_bounds = array<i64: 1, 2048>}, {transform_indices = @transform_1, window_bounds = array<i64: 1, 2048>}]} {
    %c0 = arith.constant 0 : index
    %c0_0 = arith.constant 0 : index
    %0 = vector.load %arg1[%c0, %c0_0] : memref<1x2048xf32, #tpu.memory_space<vmem>>, vector<1x2048xf32>
    %cst = arith.constant 4.471500e-02 : f32
    %1 = vector.broadcast %cst : f32 to vector<1x2048xf32>
    %2 = arith.mulf %1, %0 : vector<1x2048xf32>
    %3 = arith.mulf %2, %0 : vector<1x2048xf32>
    %4 = arith.mulf %3, %0 : vector<1x2048xf32>
    %5 = arith.addf %0, %4 : vector<1x2048xf32>
    %cst_1 = arith.constant 0.797884583 : f32
    %6 = vector.broadcast %cst_1 : f32 to vector<1x2048xf32>
    %7 = arith.mulf %6, %5 : vector<1x2048xf32>
    %cst_2 = arith.constant 5.000000e-01 : f32
    %8 = vector.broadcast %cst_2 : f32 to vector<1x2048xf32>
    %9 = arith.mulf %8, %0 : vector<1x2048xf32>
    %10 = math.tanh %7 : vector<1x2048xf32>
    %cst_3 = arith.constant 1.000000e+00 : f32
    %11 = vector.broadcast %cst_3 : f32 to vector<1x2048xf32>
    %12 = arith.addf %11, %10 : vector<1x2048xf32>
    %13 = arith.mulf %9, %12 : vector<1x2048xf32>
    %c0_4 = arith.constant 0 : index
    %c0_5 = arith.constant 0 : index
    %14 = vector.load %arg2[%c0_4, %c0_5] : memref<1x2048xf32, #tpu.memory_space<vmem>>, vector<1x2048xf32>
    tpu.vector_store %arg2[%c0_4, %c0_5], %13 {strides = array<i32>} : memref<1x2048xf32, #tpu.memory_space<vmem>>, vector<1x2048xf32>,
    return
  }
  func.func @transform_0(%arg0: i32) -> (i32, i32) {
    %c0_i32 = arith.constant 0 : i32
    %c0_i32_0 = arith.constant 0 : i32
    return %arg0, %c0_i32 : i32, i32
  }
  func.func @transform_1(%arg0: i32) -> (i32, i32) {
    %c0_i32 = arith.constant 0 : i32
    %c0_i32_0 = arith.constant 0 : i32
    return %arg0, %c0_i32 : i32, i32
  }
}

</mosaic_0001>

<bundles_post_ra>
// kernel: tpu_custom_call.1
= control target key start
LH: loop header
LB: loop body
LE: loop exit
PB: predicated region body
PF: predicated region fallthrough
CT: control target
= control target key end

     0   :  { %6 = vsyncpa [#allocation3], 0  ;;  %s148_s0 = inlined_call_operand.hbm [shape: f32[1,2048], index: 0, kind: input, shape index: {}]   ;;  %s149_s1 = inlined_call_operand.hbm [shape: f32[1,2048], index: 1, kind: output, shape index: {}]  }
   0x1   :  { %7 = vsyncpa [#allocation4], 0  ;;  %s112_s6 = smov [#allocation2]   ;;  %s64_s10 = scalar_lea.hbm %s148_s0, 256 }
   0x2   :  { %s14_s7 = sshll.u32 %s112_s6, 4  ;;  %p65_p0 = scmp.ne.s32.totalorder %s148_s0, %s64_s10  ;;  %s15_s7 = int_to_ptr.vmem [resolvable:$true] %s14_s7 }
   0x3   :  { %p68_p1 = scmp.lt.u32.totalorder %s64_s10, %s148_s0 }
   0x5   :  { %p70_p2 = pnand %p68_p1, %p65_p0 }
   0x7   :  { %73 = shalt.err (!%p70_p2)
}
   0x8   :  { %s74_s15 = scalar_lea.vmem %s15_s7, 256  ;;  %p79_p4 = scmp.lt.s32.totalorder %s15_s7, %s15_s7 }
   0x9   :  { %p75_p3 = scmp.ne.s32.totalorder %s15_s7, %s74_s15  ;;  %p80_p5 = scmp.lt.s32.totalorder %s74_s15, %s74_s15 }
   0xb   :  { %p81_p6 = por %p80_p5, %p79_p4 }
   0xd   :  { %p82_p7 = pnand %p81_p6, %p75_p3 }
   0xf   :  { %85 = shalt.err (!%p82_p7)
}
  0x10   :  { %17 = dma.hbm_to_vmem [thread:$0]  %s148_s0, 256, %s15_s7, [#allocation3]  }
  0x11   :  { %108 = dma.done.wait [#allocation3], 256  }
  0x12   :  { %109 = vsyncadd [#allocation3], 4294967040  ;;  %v21_v0 = vld [vmem:[#allocation2] sm:$0xff]  ;;  %v22_v1 = vld [vmem:[#allocation2 + $0x8] sm:$0xff]  ;;  %s113_s0 = smov [#allocation5]  }
  0x13   :  { %v23_v2 = vmul.f32 0.044715, %v21_v0  ;;  %v24_v3 = vmul.f32 0.044715, %v22_v1  ;;  %v33_v12 = vmul.f32 0.5, %v21_v0  ;;  %v34_v14 = vmul.f32 0.5, %v22_v1 }
  0x14   :  { %s49_s18 = sshll.u32 %s113_s0, 4  ;;  %s50_s18 = int_to_ptr.vmem [resolvable:$true] %s49_s18 }
  0x15   :  { %v25_v4 = vmul.f32 %v23_v2, %v21_v0  ;;  %v26_v5 = vmul.f32 %v24_v3, %v22_v1  ;;  %s86_s19 = scalar_lea.vmem %s50_s18, 256  ;;  %p91_p9 = scmp.lt.s32.totalorder %s50_s18, %s50_s18 }
  0x16   :  { %p87_p8 = scmp.ne.s32.totalorder %s50_s18, %s86_s19  ;;  %p92_p10 = scmp.lt.s32.totalorder %s86_s19, %s86_s19 }
  0x17   :  { %v27_v6 = vmul.f32 %v25_v4, %v21_v0  ;;  %v28_v7 = vmul.f32 %v26_v5, %v22_v1 }
  0x18   :  { %p93_p11 = por %p92_p10, %p91_p9 }
  0x19   :  { %v29_v8 = vadd.f32 %v27_v6, %v21_v0  ;;  %v30_v9 = vadd.f32 %v28_v7, %v22_v1 }
  0x1a   :  { %p94_p12 = pnand %p93_p11, %p87_p8 }
  0x1b   :  { %v31_v10 = vmul.f32 0.7978846, %v29_v8  ;;  %v32_v11 = vmul.f32 0.7978846, %v30_v9 }
  0x1d   :  { %60 = vtanh.f32 %v31_v10 }
  0x1e   :  { %62 = vtanh.f32 %v32_v11 }
  0x27   :  { %v61_v13 = vpop.eup %60 }
  0x28   :  { %v63_v15 = vpop.eup %62  ;;  %v37_v16 = vadd.f32 1.0, %v61_v13 }
  0x29   :  { %v38_v17 = vadd.f32 1.0, %v63_v15 }
  0x2a   :  { %v39_v18 = vmul.f32 %v37_v16, %v33_v12 }
  0x2b   :  { %v40_v19 = vmul.f32 %v38_v17, %v34_v14 }
  0x2c   :  { %41 = vst [vmem:[#allocation5] sm:$0xff] %v39_v18 }
  0x2d   :  { %42 = vst [vmem:[#allocation5 + $0x8] sm:$0xff] %v40_v19 }
  0x2e   :  { %97 = shalt.err (!%p94_p12)
}
  0x2f   :  { %s98_s22 = scalar_lea.hbm %s149_s1, 256 }
  0x30   :  { %p99_p13 = scmp.ne.s32.totalorder %s149_s1, %s98_s22  ;;  %p102_p0 = scmp.lt.u32.totalorder %s98_s22, %s149_s1 }
  0x32   :  { %p104_p1 = pnand %p102_p0, %p99_p13 }
  0x34   :  { %107 = shalt.err (!%p104_p1)
}
  0x35   :  { %52 = dma.vmem_to_hbm [thread:$0]  %s50_s18, 256, %s149_s1, [#allocation4]  }
  0x36   :  { %110 = dma.done.wait [#allocation4], 256  }
  0x37   :  { %111 = vsyncadd [#allocation4], 4294967040 }
  0x38   :  { %56 = vsyncpa [#allocation3], 1 }
  0x39   :  { %57 = vsyncpa [#allocation4], 1 }

</bundles_post_ra>
